<compile_context>
chip_gen: v7x
topology: tpu7x:2x2x1
jax: 0.10.0
libtpu: 0.0.40
codegen_flags: <defaults>
</compile_context>

<pallas_src>
import functools

import jax
import jax.numpy as jnp
from jax.experimental import pallas as pl
from jax.experimental.pallas import tpu as pltpu


def _round_up(x, m):
    return ((x + m - 1) // m) * m


def _speaker_classifier_kernel(x_ref, w_ref, b_ref, o_ref, *, n_labels):
    # x_ref: (tb, Z)   w_ref: (Z, C_pad)   b_ref: (1, C_pad)   o_ref: (tb, C)
    x = x_ref[...]
    w = w_ref[...]
    b = b_ref[...].astype(jnp.float32)          # already f32; keep epilogue f32

    # Linear layer on the MXU, canonical (M,K)x(K,N), f32 accumulation.
    logits = jnp.dot(x, w, preferred_element_type=jnp.float32) + b

    # Numerically stable LogSoftmax over the class/lane axis (PyTorch dim=1).
    # Padded lanes carry bias=-1e30 -> exp(.)==0, so they never affect m or lse.
    m = jnp.max(logits, axis=-1, keepdims=True)
    lse = m + jnp.log(jnp.sum(jnp.exp(logits - m), axis=-1, keepdims=True))

    # Store only the real classes: narrow (masked) store, but DMA bytes dominate
    # here and this avoids writing + re-reading 118 junk columns per row.
    o_ref[...] = (logits - lse)[:, :n_labels].astype(o_ref.dtype)


@functools.partial(jax.jit, static_argnames=("block_b",))
def speaker_classifier_forward(x, weight, bias, *, block_b=4096):
    """log_softmax(x @ weight.T + bias, axis=1).

    x: (B, Z) float32/bfloat16; weight: (C, Z) (PyTorch layout); bias: (C,).
    Returns (B, C) in x.dtype.
    """
    B, Z = x.shape
    C = weight.shape[0]
    C_pad = _round_up(C, 128)

    # Weight: pad classes to a full vreg width and pre-transpose ONCE in the
    # wrapper (tiny (C,Z) tensor) -> no in-kernel transpose every grid step.
    w_t = jnp.pad(weight, ((0, C_pad - C), (0, 0))).T.astype(x.dtype)   # (Z, C_pad)
    # Padded bias entries get -1e30 so padded classes are inert in the f32
    # log-sum-exp (do NOT lower the epilogue precision).
    b_pad = jnp.pad(bias.astype(jnp.float32), (0, C_pad - C),
                    constant_values=-1e30).reshape(1, C_pad)

    # Batch: pad only to a sublane multiple (<= 7 junk rows), never to a
    # multiple of the tile; partial edge tiles are handled by the pipeline.
    B8 = _round_up(B, 8)
    if B8 != B:
        x = jnp.pad(x, ((0, B8 - B), (0, 0)))

    # Tile: big enough to amortize per-step overhead, capped so the grid has
    # >= 2 steps when B allows it (v7x: both TensorCores get work).
    tb = min(block_b, _round_up(pl.cdiv(B8, 2), 8))
    tb = max(8, _round_up(tb, 8))
    grid = (pl.cdiv(B8, tb),)

    out = pl.pallas_call(
        functools.partial(_speaker_classifier_kernel, n_labels=C),
        out_shape=jax.ShapeDtypeStruct((B8, C), x.dtype),
        grid=grid,
        in_specs=[
            pl.BlockSpec((tb, Z), lambda i: (i, 0)),        # x: streamed over batch
            pl.BlockSpec((Z, C_pad), lambda i: (0, 0)),     # weight: VMEM-resident
            pl.BlockSpec((1, C_pad), lambda i: (0, 0)),     # bias:   VMEM-resident
        ],
        out_specs=pl.BlockSpec((tb, C), lambda i: (i, 0)),  # last dim == full C
        compiler_params=pltpu.CompilerParams(
            dimension_semantics=("parallel",),
        ),
    )(x, w_t, b_pad)

    return out if B8 == B else out[:B]


def _reference(x, weight, bias):
    logits = x @ weight.T + bias
    return jax.nn.log_softmax(logits, axis=1)


if __name__ == "__main__":
    # Small, module-consistent shapes: z_size=32, n_labels (len(label_dict))=10,
    # batch=8.
    B, Z, C = 8, 32, 10

    key = jax.random.PRNGKey(0)
    kx, kw, kb = jax.random.split(key, 3)

    x = jax.random.normal(kx, (B, Z), dtype=jnp.float32)
    # Deterministic nn.Linear-style init (uniform in +/- 1/sqrt(Z)).
    bound = 1.0 / (Z ** 0.5)
    weight = jax.random.uniform(kw, (C, Z), minval=-bound, maxval=bound,
                                dtype=jnp.float32)
    bias = jax.random.uniform(kb, (C,), minval=-bound, maxval=bound,
                              dtype=jnp.float32)

    out = speaker_classifier_forward(x, weight, bias)
    out = jax.block_until_ready(out)

    ref = _reference(x, weight, bias)
    assert out.shape == (B, C)
    assert out.dtype == x.dtype
    assert jnp.allclose(out, ref, atol=1e-5, rtol=1e-5), "mismatch vs reference"

    print("KERNEL_OK")
</pallas_src>

<mosaic_0001>
module attributes {stable_mosaic.version = 11 : i64} {
  func.func @_speaker_classifier_kernel(%arg0: i32, %arg1: memref<8x32xf32, #tpu.memory_space<vmem>>, %arg2: memref<32x128xf32, #tpu.memory_space<vmem>>, %arg3: memref<1x128xf32, #tpu.memory_space<vmem>>, %arg4: memref<8x10xf32, #tpu.memory_space<vmem>>) attributes {dimension_semantics = [#tpu.dimension_semantics<parallel>], iteration_bounds = array<i64: 1>, scalar_prefetch = 0 : i64, scratch_operands = 0 : i64, tpu.core_type = #tpu.core_type<tc>, window_params = [{transform_indices = @transform_0, window_bounds = array<i64: 8, 32>}, {pipeline_mode = #tpu.pipeline_mode<synchronous>, transform_indices = @transform_1, window_bounds = array<i64: 32, 128>}, {pipeline_mode = #tpu.pipeline_mode<synchronous>, transform_indices = @transform_2, window_bounds = array<i64: 1, 128>}, {transform_indices = @transform_3, window_bounds = array<i64: 8, 10>}]} {
    %c0 = arith.constant 0 : index
    %c0_0 = arith.constant 0 : index
    %0 = vector.load %arg1[%c0, %c0_0] : memref<8x32xf32, #tpu.memory_space<vmem>>, vector<8x32xf32>
    %c0_1 = arith.constant 0 : index
    %c0_2 = arith.constant 0 : index
    %1 = vector.load %arg2[%c0_1, %c0_2] : memref<32x128xf32, #tpu.memory_space<vmem>>, vector<32x128xf32>
    %c0_3 = arith.constant 0 : index
    %c0_4 = arith.constant 0 : index
    %2 = vector.load %arg3[%c0_3, %c0_4] : memref<1x128xf32, #tpu.memory_space<vmem>>, vector<1x128xf32>
    %cst = arith.constant dense<0.000000e+00> : vector<8x128xf32>
    %3 = tpu.matmul %0, %1, %cst {dimension_numbers = #tpu.dot_dimension_numbers<[1], [0], [0], [1], [0, 0, 1, 1], [], []>} : vector<8x32xf32>, vector<32x128xf32>, vector<8x128xf32> -> vector<8x128xf32>
    %4 = vector.broadcast %2 : vector<1x128xf32> to vector<8x128xf32>
    %5 = arith.addf %3, %4 : vector<8x128xf32>
    %cst_5 = arith.constant dense<0xFF800000> : vector<8xf32>
    %6 = vector.multi_reduction <maximumf>, %5, %cst_5 [1] : vector<8x128xf32> to vector<8xf32>
    %7 = vector.shape_cast %6 : vector<8xf32> to vector<8x1xf32>
    %8 = vector.broadcast %7 : vector<8x1xf32> to vector<8x128xf32>
    %9 = arith.subf %5, %8 : vector<8x128xf32>
    %10 = math.exp %9 : vector<8x128xf32>
    %cst_6 = arith.constant dense<0.000000e+00> : vector<8xf32>
    %11 = vector.multi_reduction <add>, %10, %cst_6 [1] : vector<8x128xf32> to vector<8xf32>
    %12 = vector.shape_cast %11 : vector<8xf32> to vector<8x1xf32>
    %13 = math.log %12 : vector<8x1xf32>
    %14 = arith.addf %7, %13 : vector<8x1xf32>
    %15 = vector.broadcast %14 : vector<8x1xf32> to vector<8x128xf32>
    %16 = arith.subf %5, %15 : vector<8x128xf32>
    %17 = vector.extract_strided_slice %16 {offsets = [0, 0], sizes = [8, 10], strides = [1, 1]} : vector<8x128xf32> to vector<8x10xf32>
    %c0_7 = arith.constant 0 : index
    %c0_8 = arith.constant 0 : index
    %18 = vector.load %arg4[%c0_7, %c0_8] : memref<8x10xf32, #tpu.memory_space<vmem>>, vector<8x10xf32>
    tpu.vector_store %arg4[%c0_7, %c0_8], %17 {strides = array<i32>} : memref<8x10xf32, #tpu.memory_space<vmem>>, vector<8x10xf32>,
    return
  }
  func.func @transform_0(%arg0: i32) -> (i32, i32) {
    %c0_i32 = arith.constant 0 : i32
    %c0_i32_0 = arith.constant 0 : i32
    return %arg0, %c0_i32 : i32, i32
  }
  func.func @transform_1(%arg0: i32) -> (i32, i32) {
    %c0_i32 = arith.constant 0 : i32
    %c0_i32_0 = arith.constant 0 : i32
    %c0_i32_1 = arith.constant 0 : i32
    return %c0_i32, %c0_i32_0 : i32, i32
  }
  func.func @transform_2(%arg0: i32) -> (i32, i32) {
    %c0_i32 = arith.constant 0 : i32
    %c0_i32_0 = arith.constant 0 : i32
    %c0_i32_1 = arith.constant 0 : i32
    return %c0_i32, %c0_i32_0 : i32, i32
  }
  func.func @transform_3(%arg0: i32) -> (i32, i32) {
    %c0_i32 = arith.constant 0 : i32
    %c0_i32_0 = arith.constant 0 : i32
    return %arg0, %c0_i32 : i32, i32
  }
}

</mosaic_0001>

<bundles_post_ra>
// kernel: speaker_classifier_forward.1
= control target key start
LH: loop header
LB: loop body
LE: loop exit
PB: predicated region body
PF: predicated region fallthrough
CT: control target
= control target key end

     0   :  { %v184_v3 = vmov 0.0|0.0   ;;  %vm185_vm0 = vmmov 0   ;;  %v186_v6 = vmov 0.0   ;;  %s238_s0 = inlined_call_operand.vmem [shape: f32[8,32], index: 0, kind: input, shape index: {}]   ;;  %s239_s1 = inlined_call_operand.vmem [shape: f32[32,128], index: 1, kind: input, shape index: {}]   ;;  %s240_s2 = inlined_call_operand.vmem [shape: f32[1,128], index: 2, kind: input, shape index: {}]   ;;  %s241_s3 = inlined_call_operand.hbm [shape: f32[8,10], index: 3, kind: output, shape index: {}]  }
   0x1   :  { %v16_v0 = vld [vmem:[%s239_s1] sm:$0xff]  ;;  %v17_v1 = vld [vmem:[%s239_s1 + $0x8] sm:$0xff]  ;;  %v18_v2 = vld [vmem:[%s239_s1 + $0x10] sm:$0xff]  ;;  %146 = vmatprep.subr.bf16.mxu0 %v184_v3  ;;  %143 = vmatprep.mubr.msk.f32.mxu0 %vm185_vm0, %v186_v6 }
   0x2   :  { %v147_v4 = vpack.c.bf16 %v17_v1, %v16_v0  ;;  %v19_v5 = vld [vmem:[%s239_s1 + $0x18] sm:$0xff] }
   0x3   :  { %8 = vsyncpa [#allocation3], 0  ;;  %v150_v7 = vpack.c.bf16 %v19_v5, %v18_v2  ;;  %v15_v8 = vld [vmem:[%s238_s0] sm:$0xff]  ;;  %vm27_vm1 = vcmask 261120   ;;  %s187_s0 = smov [#allocation2]   ;;  %vm112_vm2 = vcmask 80896  }
   0x4   :  { %148 = vmatpush3.bf16.msra.mxu0 %v147_v4  ;;  %v128_v9 = vld [vmem:[%s240_s2] ss:$0 sm:$0xff]  ;;  %s120_s1 = sshll.u32 %s187_s0, 4  ;;  %s121_s1 = int_to_ptr.vmem [resolvable:$true] %s120_s1 }
   0x5   :  { %149 = vmatprep.subr.bf16.mxu0 %v184_v3  ;;  %s160_s2 = scalar_lea.vmem %s121_s1, 128  ;;  %p165_p1 = scmp.lt.s32.totalorder %s121_s1, %s121_s1 }
   0x6   :  { %p161_p0 = scmp.ne.s32.totalorder %s121_s1, %s160_s2  ;;  %p166_p2 = scmp.lt.s32.totalorder %s160_s2, %s160_s2 }
   0x8   :  { %151 = vmatpush3.bf16.msra.mxu0 %v150_v7  ;;  %p167_p3 = por %p166_p2, %p165_p1 }
   0xa   :  { %p168_p4 = pnand %p167_p3, %p161_p0 }
   0xb   :  { %144 = vmatmul.mubr.msk.f32.vlgmr.msra.gmra.mrb[0].mxu0 %vm27_vm1, %v15_v8 }
  0xde   :  { %v97_v10 = vpop.f32.mrb[0].mxu0 }
  0xdf   :  { %v98_v11 = vadd.f32 %v128_v9, %v97_v10  ;;  %v145_v12 = vpop.f32.mrb[1].mxu0 }
  0xe1   :  { %101 = vmax.xlane.f32.xlu0 %v98_v11 }
 0x16e   :  { %v102_v13 = vpop.xlane.xlu0 %101 }
 0x16f   :  { %v103_v14 = vsub.f32 %v98_v11, %v102_v13 }
 0x171   :  { %v104_v15 = vmul.f32 1.442695, %v103_v14 }
 0x173   :  { %156 = vpow2.f32 %v104_v15 }
 0x17d   :  { %v157_v16 = vpop.eup %156 }
 0x17e   :  { %106 = vadd.xlane.f32.xlu0 %v157_v16 }
 0x20b   :  { %v107_v17 = vpop.xlane.xlu0 %106 }
 0x20c   :  { %158 = vlog2.f32 %v107_v17 }
 0x216   :  { %v159_v18 = vpop.eup %158 }
 0x217   :  { %v109_v19 = vmul.f32 0.6931472, %v159_v18 }
 0x219   :  { %v110_v20 = vadd.f32 %v109_v19, %v102_v13 }
 0x21b   :  { %v111_v21 = vsub.f32 %v98_v11, %v110_v20 }
 0x21d   :  { %113 = vst.msk [vmem:[#allocation2] sm:$0xff] %vm112_vm2, %v111_v21 }
 0x21e   :  { %171 = shalt.err (!%p168_p4)
}
 0x21f   :  { %s172_s26 = scalar_lea.hbm %s241_s3, 128 }
 0x220   :  { %p173_p5 = scmp.ne.s32.totalorder %s241_s3, %s172_s26  ;;  %p176_p6 = scmp.lt.u32.totalorder %s172_s26, %s241_s3 }
 0x222   :  { %p178_p7 = pnand %p176_p6, %p173_p5 }
 0x224   :  { %181 = shalt.err (!%p178_p7)
}
 0x225   :  { %123 = dma.vmem_to_hbm [thread:$0]  %s121_s1, 128, %s241_s3, [#allocation3]  }
 0x226   :  { %182 = dma.done.wait [#allocation3], 128  }
 0x227   :  { %183 = vsyncadd [#allocation3], 4294967168 }
 0x228   :  { %127 = vsyncpa [#allocation3], 1 }

</bundles_post_ra>
